<compile_context>
chip_gen: v6e
topology: v6e:2x2x1
jax: 0.10.0
libtpu: 0.0.40
codegen_flags: <defaults>
</compile_context>

<pallas_src>
import functools

import jax
import jax.numpy as jnp
from jax.experimental import pallas as pl
from jax.experimental.pallas import tpu as pltpu


def _round_up(v, m):
    return (v + m - 1) // m * m


def gcn_layer_kernel(adj_ref, x_ref, w_ref, b_ref, out_ref, acc_ref, *,
                     activation, valid_cols):
    """One grid step of a fused GCN layer: acc += adj_blk @ (x_blk @ W)."""
    k = pl.program_id(1)

    @pl.when(k == 0)
    def _():
        acc_ref[...] = jnp.zeros_like(acc_ref)

    # (tk, Din) @ (Din, Dp): bf16 MXU inputs, f32 accumulation.
    xw = jnp.dot(x_ref[...], w_ref[...], preferred_element_type=jnp.float32)
    # (tm, tk) @ (tk, Dp): the dominant N^2-cost matmul, bf16 in / f32 acc.
    acc_ref[...] += jnp.dot(adj_ref[...], xw.astype(jnp.bfloat16),
                            preferred_element_type=jnp.float32)

    @pl.when(k == pl.num_programs(1) - 1)
    def _():
        o = acc_ref[...] + b_ref[...]          # f32 bias add
        if activation == "relu":
            out_ref[...] = jnp.maximum(o, 0.0).astype(out_ref.dtype)
        else:
            # log_softmax over the first `valid_cols` lanes only (rest is padding).
            col = jax.lax.broadcasted_iota(jnp.int32, o.shape, dimension=1)
            mask = col < valid_cols
            o = jnp.where(mask, o, jnp.float32(-1e30))
            m = jnp.max(o, axis=-1, keepdims=True)
            s = o - m
            e = jnp.where(mask, jnp.exp(s), 0.0)
            lse = jnp.log(jnp.sum(e, axis=-1, keepdims=True))
            out_ref[...] = (s - lse).astype(out_ref.dtype)


def _gcn_layer(adj, x, w, b, *, activation, valid_cols, out_dtype, tm, tk):
    """out = act(adj @ (x @ w) + b), tiled over (node rows, adj columns)."""
    n_pad = adj.shape[0]
    din = x.shape[1]
    dp = w.shape[1]
    kernel = functools.partial(gcn_layer_kernel, activation=activation,
                               valid_cols=valid_cols)
    return pl.pallas_call(
        kernel,
        out_shape=jax.ShapeDtypeStruct((n_pad, dp), out_dtype),
        grid_spec=pltpu.PrefetchScalarGridSpec(
            num_scalar_prefetch=0,
            grid=(n_pad // tm, n_pad // tk),               # reduction axis last
            in_specs=[
                pl.BlockSpec((tm, tk), lambda i, k: (i, k)),    # adjacency tile
                pl.BlockSpec((tk, din), lambda i, k: (k, 0)),   # feature rows of tile k
                pl.BlockSpec((din, dp), lambda i, k: (0, 0)),   # full weight (lane-dense)
                pl.BlockSpec((1, dp), lambda i, k: (0, 0)),     # bias (f32)
            ],
            out_specs=pl.BlockSpec((tm, dp), lambda i, k: (i, 0)),
            scratch_shapes=[pltpu.VMEM((tm, dp), jnp.float32)],
        ),
        compiler_params=pltpu.CompilerParams(
            dimension_semantics=("parallel", "arbitrary")),
    )(adj, x, w, b)


def my_gcn_forward(x, adj, w1, b1, w2, b2, *, tile=256):
    """log_softmax(A @ relu(A @ X W1 + b1) @ W2 + b2), A = normalized adjacency."""
    n, din = x.shape
    hid = w1.shape[1]
    out = w2.shape[1]
    n_pad = _round_up(n, tile)
    hp = _round_up(hid, 128)
    cp = _round_up(out, 128)

    # Pad to tile-/lane-aligned shapes; cast matmul operands to bf16.
    adj_p = jnp.zeros((n_pad, n_pad), jnp.float32).at[:n, :n].set(adj).astype(jnp.bfloat16)
    x_p = jnp.zeros((n_pad, din), jnp.float32).at[:n, :].set(x).astype(jnp.bfloat16)
    w1_p = jnp.zeros((din, hp), jnp.float32).at[:, :hid].set(w1).astype(jnp.bfloat16)
    b1_p = jnp.zeros((1, hp), jnp.float32).at[:, :hid].set(b1.reshape(1, -1))
    w2_p = jnp.zeros((hp, cp), jnp.float32).at[:hid, :out].set(w2).astype(jnp.bfloat16)
    b2_p = jnp.zeros((1, cp), jnp.float32).at[:, :out].set(b2.reshape(1, -1))

    # Layer 1: relu(A @ X W1 + b1); padded hidden lanes stay exactly 0.
    h = _gcn_layer(adj_p, x_p, w1_p, b1_p, activation="relu", valid_cols=hp,
                   out_dtype=jnp.bfloat16, tm=tile, tk=tile)
    # Layer 2: log_softmax(A @ H W2 + b2) over the real `out` classes.
    o = _gcn_layer(adj_p, h, w2_p, b2_p, activation="log_softmax", valid_cols=out,
                   out_dtype=jnp.float32, tm=tile, tk=tile)
    return o[:n, :out]


def build_norm_adj(edge_index, num_nodes):
    """Dense symmetric GCN normalization: D^-1/2 (A + I) D^-1/2 (plain-JAX glue)."""
    src = edge_index[0]
    dst = edge_index[1]
    a = jnp.zeros((num_nodes, num_nodes), jnp.float32).at[dst, src].set(1.0)
    a = jnp.maximum(a, jnp.eye(num_nodes, dtype=jnp.float32))  # add self-loops
    deg = a.sum(axis=1)
    dinv = jnp.where(deg > 0, 1.0 / jnp.sqrt(deg), 0.0)
    return dinv[:, None] * a * dinv[None, :]


def glorot(key, shape):
    fan_in, fan_out = shape
    lim = jnp.sqrt(6.0 / (fan_in + fan_out))
    return jax.random.uniform(key, shape, jnp.float32, -lim, lim)


def _ref_forward(x, adj, w1, b1, w2, b2):
    """Pure-JAX f32 reference of the module forward (on already-quantized inputs)."""
    h = jnp.maximum(adj @ (x @ w1) + b1.reshape(1, -1), 0.0)
    o = adj @ (h @ w2) + b2.reshape(1, -1)
    return jax.nn.log_softmax(o, axis=1)


if __name__ == "__main__":
    # Synthetic graph consistent with the module's forward:
    #   N nodes, input_dim=16, hidden_dim=32, output_dim=8 (classes).
    num_nodes, input_dim, hidden_dim, output_dim = 512, 16, 32, 8

    key = jax.random.PRNGKey(0)
    k_x, k_e, k_w1, k_w2 = jax.random.split(key, 4)

    # Node features.
    x = jax.random.normal(k_x, (num_nodes, input_dim), jnp.float32)

    # Deterministic random undirected edge_index [2, E].
    num_rand_edges = 2000
    e_src = jax.random.randint(k_e, (num_rand_edges,), 0, num_nodes)
    e_dst = jax.random.randint(jax.random.fold_in(k_e, 1), (num_rand_edges,), 0, num_nodes)
    edge_index = jnp.stack(
        [jnp.concatenate([e_src, e_dst]), jnp.concatenate([e_dst, e_src])], axis=0
    )  # symmetric (undirected) graph

    # Deterministic parameter init (GCNConv: weight [in, out] glorot, bias zeros).
    w1 = glorot(k_w1, (input_dim, hidden_dim))
    b1 = jnp.zeros((hidden_dim,), jnp.float32)
    w2 = glorot(k_w2, (hidden_dim, output_dim))
    b2 = jnp.zeros((output_dim,), jnp.float32)

    adj = build_norm_adj(edge_index, num_nodes)

    out = my_gcn_forward(x, adj, w1, b1, w2, b2)
    out = jax.block_until_ready(out)

    # --- correctness checks ---
    assert out.shape == (num_nodes, output_dim)
    # log_softmax rows must exponentiate-sum to ~1 (computed in f32 in-kernel).
    row_sums = jnp.exp(out).sum(axis=1)
    assert bool(jnp.all(jnp.abs(row_sums - 1.0) < 1e-4))
    # Compare against an f32 reference evaluated on bf16-quantized inputs
    # (isolates accumulation-order / intermediate-cast error only).
    q = lambda a: a.astype(jnp.bfloat16).astype(jnp.float32)
    ref = _ref_forward(q(x), q(adj), q(w1), b1, q(w2), b2)
    max_diff = float(jnp.max(jnp.abs(out - ref)))
    assert max_diff < 0.15, f"max diff vs reference too large: {max_diff}"

    print("KERNEL_OK")
</pallas_src>

<mosaic_0001>
module attributes {stable_mosaic.version = 11 : i64} {
  func.func @gcn_layer_kernel(%arg0: i32, %arg1: i32, %arg2: memref<256x256xbf16, #tpu.memory_space<vmem>>, %arg3: memref<256x16xbf16, #tpu.memory_space<vmem>>, %arg4: memref<16x128xbf16, #tpu.memory_space<vmem>>, %arg5: memref<1x128xf32, #tpu.memory_space<vmem>>, %arg6: memref<256x128xbf16, #tpu.memory_space<vmem>>, %arg7: memref<256x128xf32, #tpu.memory_space<vmem>>) attributes {dimension_semantics = [#tpu.dimension_semantics<parallel>, #tpu.dimension_semantics<arbitrary>], iteration_bounds = array<i64: 2, 2>, scalar_prefetch = 0 : i64, scratch_operands = 1 : i64, tpu.core_type = #tpu.core_type<tc>, window_params = [{transform_indices = @transform_0, window_bounds = array<i64: 256, 256>}, {transform_indices = @transform_1, window_bounds = array<i64: 256, 16>}, {pipeline_mode = #tpu.pipeline_mode<synchronous>, transform_indices = @transform_2, window_bounds = array<i64: 16, 128>}, {pipeline_mode = #tpu.pipeline_mode<synchronous>, transform_indices = @transform_3, window_bounds = array<i64: 1, 128>}, {transform_indices = @transform_4, window_bounds = array<i64: 256, 128>}]} {
    %c0_i32 = arith.constant 0 : i32
    %0 = arith.cmpi eq, %arg1, %c0_i32 : i32
    %1 = arith.extui %0 : i1 to i32
    %c0_i32_0 = arith.constant 0 : i32
    %2 = arith.cmpi ne, %1, %c0_i32_0 : i32
    scf.if %2 {
      %cst_12 = arith.constant 0.000000e+00 : f32
      %15 = vector.broadcast %cst_12 : f32 to vector<256x128xf32>
      %c0_13 = arith.constant 0 : index
      %c0_14 = arith.constant 0 : index
      %16 = vector.load %arg7[%c0_13, %c0_14] : memref<256x128xf32, #tpu.memory_space<vmem>>, vector<256x128xf32>
      tpu.vector_store %arg7[%c0_13, %c0_14], %15 {strides = array<i32>} : memref<256x128xf32, #tpu.memory_space<vmem>>, vector<256x128xf32>,
    } else {
    }
    %c0 = arith.constant 0 : index
    %c0_1 = arith.constant 0 : index
    %3 = vector.load %arg3[%c0, %c0_1] : memref<256x16xbf16, #tpu.memory_space<vmem>>, vector<256x16xbf16>
    %c0_2 = arith.constant 0 : index
    %c0_3 = arith.constant 0 : index
    %4 = vector.load %arg4[%c0_2, %c0_3] : memref<16x128xbf16, #tpu.memory_space<vmem>>, vector<16x128xbf16>
    %cst = arith.constant dense<0.000000e+00> : vector<256x128xf32>
    %5 = tpu.matmul %3, %4, %cst {dimension_numbers = #tpu.dot_dimension_numbers<[1], [0], [0], [1], [0, 0, 1, 1], [], []>} : vector<256x16xbf16>, vector<16x128xbf16>, vector<256x128xf32> -> vector<256x128xf32>
    %c0_4 = arith.constant 0 : index
    %c0_5 = arith.constant 0 : index
    %6 = vector.load %arg7[%c0_4, %c0_5] : memref<256x128xf32, #tpu.memory_space<vmem>>, vector<256x128xf32>
    %c0_6 = arith.constant 0 : index
    %c0_7 = arith.constant 0 : index
    %7 = vector.load %arg2[%c0_6, %c0_7] : memref<256x256xbf16, #tpu.memory_space<vmem>>, vector<256x256xbf16>
    %8 = arith.truncf %5 : vector<256x128xf32> to vector<256x128xbf16>
    %cst_8 = arith.constant dense<0.000000e+00> : vector<256x128xf32>
    %9 = tpu.matmul %7, %8, %cst_8 {dimension_numbers = #tpu.dot_dimension_numbers<[1], [0], [0], [1], [0, 0, 1, 1], [], []>} : vector<256x256xbf16>, vector<256x128xbf16>, vector<256x128xf32> -> vector<256x128xf32>
    %10 = arith.addf %6, %9 : vector<256x128xf32>
    %c0_9 = arith.constant 0 : index
    %c0_10 = arith.constant 0 : index
    %11 = vector.load %arg7[%c0_9, %c0_10] : memref<256x128xf32, #tpu.memory_space<vmem>>, vector<256x128xf32>
    tpu.vector_store %arg7[%c0_9, %c0_10], %10 {strides = array<i32>} : memref<256x128xf32, #tpu.memory_space<vmem>>, vector<256x128xf32>,
    %c1_i32 = arith.constant 1 : i32
    %12 = arith.cmpi eq, %arg1, %c1_i32 : i32
    %13 = arith.extui %12 : i1 to i32
    %c0_i32_11 = arith.constant 0 : i32
    %14 = arith.cmpi ne, %13, %c0_i32_11 : i32
    scf.if %14 {
      %c0_12 = arith.constant 0 : index
      %c0_13 = arith.constant 0 : index
      %15 = vector.load %arg7[%c0_12, %c0_13] : memref<256x128xf32, #tpu.memory_space<vmem>>, vector<256x128xf32>
      %c0_14 = arith.constant 0 : index
      %c0_15 = arith.constant 0 : index
      %16 = vector.load %arg5[%c0_14, %c0_15] : memref<1x128xf32, #tpu.memory_space<vmem>>, vector<1x128xf32>
      %17 = vector.broadcast %16 : vector<1x128xf32> to vector<256x128xf32>
      %18 = arith.addf %15, %17 : vector<256x128xf32>
      %cst_16 = arith.constant 0.000000e+00 : f32
      %19 = vector.broadcast %cst_16 : f32 to vector<256x128xf32>
      %20 = arith.maximumf %18, %19 : vector<256x128xf32>
      %21 = arith.truncf %20 : vector<256x128xf32> to vector<256x128xbf16>
      %c0_17 = arith.constant 0 : index
      %c0_18 = arith.constant 0 : index
      %22 = vector.load %arg6[%c0_17, %c0_18] : memref<256x128xbf16, #tpu.memory_space<vmem>>, vector<256x128xbf16>
      tpu.vector_store %arg6[%c0_17, %c0_18], %21 {strides = array<i32>} : memref<256x128xbf16, #tpu.memory_space<vmem>>, vector<256x128xbf16>,
    } else {
    }
    return
  }
  func.func @transform_0(%arg0: i32, %arg1: i32) -> (i32, i32) {
    %c0_i32 = arith.constant 0 : i32
    return %arg0, %arg1 : i32, i32
  }
  func.func @transform_1(%arg0: i32, %arg1: i32) -> (i32, i32) {
    %c0_i32 = arith.constant 0 : i32
    %c0_i32_0 = arith.constant 0 : i32
    return %arg1, %c0_i32 : i32, i32
  }
  func.func @transform_2(%arg0: i32, %arg1: i32) -> (i32, i32) {
    %c0_i32 = arith.constant 0 : i32
    %c0_i32_0 = arith.constant 0 : i32
    %c0_i32_1 = arith.constant 0 : i32
    return %c0_i32, %c0_i32_0 : i32, i32
  }
  func.func @transform_3(%arg0: i32, %arg1: i32) -> (i32, i32) {
    %c0_i32 = arith.constant 0 : i32
    %c0_i32_0 = arith.constant 0 : i32
    %c0_i32_1 = arith.constant 0 : i32
    return %c0_i32, %c0_i32_0 : i32, i32
  }
  func.func @transform_4(%arg0: i32, %arg1: i32) -> (i32, i32) {
    %c0_i32 = arith.constant 0 : i32
    %c0_i32_0 = arith.constant 0 : i32
    return %arg0, %c0_i32 : i32, i32
  }
}

</mosaic_0001>

<bundles_post_ra>
// kernel: tpu_custom_call.1
= control target key start
LH: loop header
LB: loop body
LE: loop exit
PB: predicated region body
PF: predicated region fallthrough
CT: control target
= control target key end

     0   :  { %9 = vsyncpa [#allocation4], 0  ;;  %s2591_s0 = inlined_call_operand.hbm [shape: bf16[512,512], index: 0, kind: input, shape index: {}]   ;;  %s2592_s1 = inlined_call_operand.vmem [shape: bf16[512,16], index: 1, kind: input, shape index: {}]   ;;  %s2593_s2 = inlined_call_operand.vmem [shape: bf16[16,128], index: 2, kind: input, shape index: {}]   ;;  %s2594_s3 = inlined_call_operand.vmem [shape: f32[1,128], index: 3, kind: input, shape index: {}]   ;;  %s2595_s4 = inlined_call_operand.hbm [shape: bf16[512,128], index: 4, kind: output, shape index: {}]  }
   0x1   :  { %11 = vsyncpa [#allocation4 + $0x1], 0 }
   0x2   :  { %12 = vsyncpa [#allocation5], 0 }
   0x3   :  { %14 = vsyncpa [#allocation5 + $0x1], 0  ;;  %s2253_s15 = smov 0   ;;  %s2255_s16 = smov 0  }
   0x4   :  { %s2257_s17 = smov 0   ;;  %s2259_s18 = smov 0  }
   0x5   :  { %s2261_s19 = smov 0   ;;  %s2263_s20 = smov 0  }
   0x6   :  { %s2265_s21 = smov 0   ;;  %s2267_s22 = smov 0  }
   0x7   :  { %s2269_s23 = smov 0   ;;  %s2271_s24 = smov 0  }
   0x8   :  { %s2273_s25 = smov 0  }
   0x9 LB: > { %2600 = sst [smem:[#allocation9_spill]] %s2198_s20  ;;  %s1470_s26 = sadd.s32 4294967295, %s2218_s25   ;;  %s2218_s25 = sphi %s2273_s25, %s20_s25   ;;  %s2214_s24 = sphi %s2271_s24, %s2624_s24   ;;  %s2210_s23 = sphi %s2269_s23, %s2623_s23   ;;  %s2206_s22 = sphi %s2267_s22, %s2614_s22   ;;  %s2202_s21 = sphi %s2265_s21, %s2622_s21   ;;  %s2198_s20 = sphi %s2263_s20, %s2613_s20   ;;  %s2194_s19 = sphi %s2261_s19, %s2621_s19   ;;  %s2190_s18 = sphi %s2259_s18, %s2620_s18   ;;  %s2186_s17 = sphi %s2257_s17, %s2619_s17   ;;  %s2182_s16 = sphi %s2255_s16, %s2618_s16   ;;  %s2178_s15 = sphi %s2253_s15, %s2617_s15  }
   0xa   : > { %2601 = sst [smem:[#allocation10_spill]] %s2214_s24  ;;  %s1471_s27 = sadd.s32 4294967294, %s2218_s25  }
   0xb   : > { %s29_s28 = sadd.s32 1, %s2210_s23  ;;  %s32_s29 = sadd.s32 1, %s2214_s24 }
   0xc   : > { %p30_p0 = scmp.ge.s32.totalorder %s29_s28, 2  ;;  %s41_s30 = sadd.s32 1, %s2198_s20 }
   0xd   : > { %p48_p1 = scmp.ne.s32.totalorder %s2198_s20, %s2194_s19  ;;  %p49_p2 = scmp.eq.s32.totalorder %s2218_s25, 0 }
   0xe   : > { %s2626_s28 = smov (%p30_p0, %s29_s28), 0  ;;  %s2628_s29 = smov (!%p30_p0, %s32_s29), %s2214_s24 }
   0xf   : > { %2602 = sst [smem:[#allocation11_spill]] %s2626_s28  ;;  %s37_s5 = ssub.s32 %s2210_s23, %s2626_s28 }
  0x10   : > { %p2319_p3 = por %p49_p2, %p48_p1  ;;  %p34_p4 = scmp.ge.s32.totalorder %s2628_s29, 2 }
  0x11   : > { %p54_p5 = scmp.ne.s32.totalorder %s2194_s19, %s2190_s18  ;;  %p55_p6 = scmp.eq.s32.totalorder %s1470_s26, 0 }
  0x12   : > { %s135_s7 = sadd.s32 1, %s2186_s17  ;;  %s2630_s29 = smov (%p34_p4, %s2628_s29), 0 }
  0x13   : > { %2604 = sst [smem:[#allocation12_spill]] %s2630_s29  ;;  %p2327_p7 = por %p55_p6, %p54_p5 }
  0x14   : > { %p145_p8 = scmp.ne.s32.totalorder %s2186_s17, %s2182_s16  ;;  %s36_s9 = ssub.s32 %s2214_s24, %s2630_s29 }
  0x15   : > { %p146_p9 = scmp.eq.s32.totalorder %s1470_s26, 3  ;;  %s38_s10 = sor.u32 %s37_s5, %s36_s9 }
  0x16   : > { %p133_p10 = scmp.eq.s32.totalorder %s36_s9, 0  ;;  %p39_p11 = scmp.eq.s32.totalorder %s38_s10, 0 }
  0x17   : > { %p2335_p12 = por %p146_p9, %p145_p8  ;;  %p151_p13 = scmp.ne.s32.totalorder %s2182_s16, %s2178_s15 }
  0x18   : > { %s2340_s12 = scalar_select %p133_p10, %s2186_s17, %s135_s7  }
  0x19   : > { %s2343_s13 = scalar_select %p39_p11, %s2198_s20, %s41_s30  }
  0x1a   : > { %2607 = sst [smem:[#allocation13_spill]] %s2340_s12  ;;  %p152_p0 = scmp.eq.s32.totalorder %s1471_s27, 3 }
  0x1b   : > { %2608 = sst [smem:[#allocation14_spill]] %s2343_s13  ;;  %p1909_p1 = scmp.lt.s32.totalorder %s2218_s25, 4 }
  0x1c   : > { %p2348_p2 = por %p152_p0, %p151_p13  ;;  %s178_s18 = sand.u32 1, %s2198_s20  }
  0x1d   : > { %s1474_s26 = sshll.u32 %s178_s18, 8  ;;  %s1476_s5 = sshll.u32 %s2210_s23, 1 }
  0x1e   : > { %s1589_s9 = sshll.u32 %s2214_s24, 7  ;;  %s182_s10 = scalar_lea.vmem [#allocation3], %s1474_s26 }
  0x1f   : > { %s192_s29 = sshll.u32 %s182_s10, 4  ;;  %s189_s28 = sadd.s32 %s1589_s9, %s1476_s5  ;;  %s193_s29 = int_to_ptr.vmem [resolvable:$true] %s192_s29 }
  0x20   : > { %s1478_s7 = sshll.u32 %s189_s28, 6  ;;  %p2357_p4 = pnand %p1909_p1, %p2319_p3 }
  0x21   : > { %s191_s12 = scalar_lea.hbm %s2591_s0, %s1478_s7  ;;  %p1479_p5 = scmp.ge.s32.totalorder %s2218_s25, 1 }
  0x22   : > { %s179_s20 = scalar_lea.sflag [#allocation4], %s178_s18  ;;  %p2072_p6 = pneg %p2357_p4 }
  0x23   : > { %s2083_s24 = scalar_lea.vmem %s193_s29, 4096  ;;  %s2220_s26 = smov [#allocation3]  }
  0x24   : > { %p2084_p8 = scmp.ne.s32.totalorder %s193_s29, %s2083_s24  ;;  %s2088_s28 = sshll.u32 %s2220_s26, 4  ;;  %s2089_s28 = int_to_ptr.vmem [resolvable:$false] %s2088_s28 }
  0x25   : > { %s2090_s6 = scalar_lea.vmem %s2089_s28, 8192  ;;  %p2091_p3 = scmp.lt.s32.totalorder %s193_s29, %s2089_s28 }
  0x26   : > { %p2086_p9 = pnand %p2084_p8, %p2072_p6  ;;  %p2092_p11 = scmp.lt.s32.totalorder %s2090_s6, %s2083_s24 }
  0x28   : > { %p2087_p10 = pneg %p2086_p9  ;;  %p2093_p13 = por %p2092_p11, %p2091_p3 }
  0x2a   : > { %p2094_p0 = pnand %p2093_p13, %p2087_p10 }
  0x2c   : > { %2097 = shalt.err (!%p2094_p0)
}
  0x2d   : > { %s2221_s13 = smov 256   ;;  %s2222_s18 = smov 128  }
  0x2e   : > { %s2223_s5 = smov 8   ;;  %p209_p1 = scmp.lt.s32.totalorder %s2218_s25, 5 }
  0x2f   : > { %1904 = dma.hbm_to_vmem [thread:$0]  (!%p2357_p4), %s191_s12, 4096, %s193_s29, %s179_s20, %s2221_s13, %s2222_s18, %s2223_s5  }
  0x30   : > { %p210_p6 = pnand %p1479_p5, %p209_p1 }
  0x31   : > { %s215_s9 = sand.u32 (!%p210_p6), 1, %s2194_s19  }
  0x32   : > { %213 = sbr.rel (%p210_p6) target bundleno = 708 (0x2c4), region = 36  ;;  %s1480_s10 = sshll.u32 (!%p210_p6), %s215_s9, 8 }
  0x33   : > { %s216_s24 = scalar_lea.sflag (!%p210_p6), [#allocation4], %s215_s9  ;;  %s2373_s7 = scalar_lea.vmem (!%p210_p6), [#allocation3], %s1480_s10 }
  0x37   : > { %2169 = dma.done.wait (%p2327_p7), %s216_s24, 4096  }
  0x38   : > { %2171 = vsyncadd (%p2327_p7), %s216_s24, 4294963200  ;;  %s246_s20 = sand.u32 1, %s2182_s16   ;;  %s1482_s29 = sshll.u32 %s2202_s21, 5 }
  0x39   : > { %s1481_s12 = sshll.u32 %s246_s20, 7  ;;  %p252_p4 = scmp.lt.s32.totalorder %s1482_s29, 63 }
  0x3a   : > { %s2388_s6 = scalar_lea.vmem [#allocation6], %s1481_s12  ;;  %p1484_p5 = scmp.ne.s32.totalorder %s2202_s21, 0 }
  0x3b   : > { %s2632_s29 = smov (!%p252_p4, %s1482_s29), 63 }
  0x3c   : > { %s1483_s30 = sshll.u32 %s2632_s29, 2  ;;  %262 = sbr.rel (%p1484_p5) target bundleno = 82 (0x52), region = 44 }
  0x3d   : > { %s2386_s28 = scalar_lea.vmem %s2592_s1, %s1483_s30 }
  0x41   : > { %v2224_v0 = vmov 0.0  }
  0x42   : > { %263 = vst [vmem:[#allocation2 + $0xb0] sm:$0xff] %v2224_v0  ;;  %264 = vst [vmem:[#allocation2] sm:$0xff] %v2224_v0 }
  0x43   : > { %265 = vst [vmem:[#allocation2 + $0xd8] sm:$0xff] %v2224_v0  ;;  %266 = vst [vmem:[#allocation2 + $0x18] sm:$0xff] %v2224_v0 }
  0x44   : > { %267 = vst [vmem:[#allocation2 + $0x50] sm:$0xff] %v2224_v0  ;;  %268 = vst [vmem:[#allocation2 + $0x68] sm:$0xff] %v2224_v0 }
  0x45   : > { %269 = vst [vmem:[#allocation2 + $0x30] sm:$0xff] %v2224_v0  ;;  %270 = vst [vmem:[#allocation2 + $0x48] sm:$0xff] %v2224_v0 }
  0x46   : > { %271 = vst [vmem:[#allocation2 + $0x80] sm:$0xff] %v2224_v0  ;;  %272 = vst [vmem:[#allocation2 + $0x88] sm:$0xff] %v2224_v0 }
  0x47   : > { %273 = vst [vmem:[#allocation2 + $0xe8] sm:$0xff] %v2224_v0  ;;  %274 = vst [vmem:[#allocation2 + $0xb8] sm:$0xff] %v2224_v0 }
  0x48   : > { %275 = vst [vmem:[#allocation2 + $0x60] sm:$0xff] %v2224_v0  ;;  %276 = vst [vmem:[#allocation2 + $0xf0] sm:$0xff] %v2224_v0 }
  0x49   : > { %277 = vst [vmem:[#allocation2 + $0x8] sm:$0xff] %v2224_v0  ;;  %278 = vst [vmem:[#allocation2 + $0x78] sm:$0xff] %v2224_v0 }
  0x4a   : > { %279 = vst [vmem:[#allocation2 + $0x38] sm:$0xff] %v2224_v0  ;;  %280 = vst [vmem:[#allocation2 + $0x58] sm:$0xff] %v2224_v0 }
  0x4b   : > { %281 = vst [vmem:[#allocation2 + $0x40] sm:$0xff] %v2224_v0  ;;  %282 = vst [vmem:[#allocation2 + $0xc8] sm:$0xff] %v2224_v0 }
  0x4c   : > { %283 = vst [vmem:[#allocation2 + $0xe0] sm:$0xff] %v2224_v0  ;;  %284 = vst [vmem:[#allocation2 + $0x90] sm:$0xff] %v2224_v0 }
  0x4d   : > { %285 = vst [vmem:[#allocation2 + $0x70] sm:$0xff] %v2224_v0  ;;  %286 = vst [vmem:[#allocation2 + $0xc0] sm:$0xff] %v2224_v0 }
  0x4e   : > { %287 = vst [vmem:[#allocation2 + $0xa8] sm:$0xff] %v2224_v0  ;;  %288 = vst [vmem:[#allocation2 + $0xd0] sm:$0xff] %v2224_v0 }
  0x4f   : > { %289 = vst [vmem:[#allocation2 + $0x10] sm:$0xff] %v2224_v0  ;;  %290 = vst [vmem:[#allocation2 + $0x28] sm:$0xff] %v2224_v0 }
  0x50   : > { %291 = vst [vmem:[#allocation2 + $0xa0] sm:$0xff] %v2224_v0  ;;  %292 = vst [vmem:[#allocation2 + $0xf8] sm:$0xff] %v2224_v0 }
  0x51   : > { %293 = vst [vmem:[#allocation2 + $0x20] sm:$0xff] %v2224_v0  ;;  %294 = vst [vmem:[#allocation2 + $0x98] sm:$0xff] %v2224_v0 }
  0x52 PF: > { %v2005_v1 = vld [vmem:[%s2593_s2] sm:$0xff]   ;;  %vm415_vm0 = vcmask 130048   ;;  %v2007_v3 = vld [vmem:[%s2386_s28 + $0x8] sm:$0xff]   ;;  %v2008_v4 = vld [vmem:[%s2386_s28 + $0x10] sm:$0xff]   ;;  %p1550_p7 = scmp.ne.s32.totalorder %s2202_s21, 1 }
  0x53   : > { %v2006_v2 = vld [vmem:[%s2386_s28] sm:$0xff]   ;;  %1847 = vmatprep.subr.bf16.mxu0 %v2005_v1  ;;  %v2009_v5 = vld [vmem:[%s2386_s28 + $0x18] sm:$0xff]   ;;  %v2011_v7 = vld [vmem:[%s2386_s28 + $0x28] sm:$0xff]  }
  0x54   : > { %1848 = vmatpush3.bf16.msra.mxu0 %v2005_v1  ;;  %1849 = vmatprep.mubr.msk.bf16.mxu0 %vm415_vm0, %v2006_v2  ;;  %v2010_v6 = vld [vmem:[%s2386_s28 + $0x20] sm:$0xff]   ;;  %v2012_v8 = vld [vmem:[%s2386_s28 + $0x30] sm:$0xff]   ;;  %v2013_v9 = vld [vmem:[%s2386_s28 + $0x38] sm:$0xff]  }
  0x55   : > { %v2014_v10 = vld [vmem:[%s2386_s28 + $0x40] sm:$0xff]   ;;  %v2015_v11 = vld [vmem:[%s2386_s28 + $0x48] sm:$0xff]   ;;  %v2016_v12 = vld [vmem:[%s2386_s28 + $0x50] sm:$0xff]  }
  0x56   : > { %v2017_v13 = vld [vmem:[%s2386_s28 + $0x58] sm:$0xff]   ;;  %v2018_v14 = vld [vmem:[%s2386_s28 + $0x60] sm:$0xff]   ;;  %v2019_v15 = vld [vmem:[%s2386_s28 + $0x68] sm:$0xff]  }
  0x57   : > { %1850 = vmatmul.mubr.msk.bf16.vlgmr.msra.gmra.mxu0 %vm415_vm0, %v2007_v3  ;;  %v2020_v16 = vld [vmem:[%s2386_s28 + $0x70] sm:$0xff]   ;;  %v2021_v17 = vld [vmem:[%s2386_s28 + $0x78] sm:$0xff]   ;;  %v2042_v24 = vld [vmem:[%s2373_s7 + $0x4] ss:$8 sps:$4 sm:$0xff]  }
  0x58   : > { %1853 = vmatprep.mubr.msk.bf16.mxu0 %vm415_vm0, %v2008_v4  ;;  %v2024_v18 = vld [vmem:[%s2373_s7 + $0x54] ss:$8 sps:$4 sm:$0xff]   ;;  %v2022_v4 = vld [vmem:[%s2373_s7 + $0x50] ss:$8 sps:$4 sm:$0xff]  }
  0x59   : > { %937 = vmatprep.mubr.bf16.mxu1 %v2024_v18  ;;  %v2034_v18 = vld [vmem:[%s2373_s7 + $0x94] ss:$8 sps:$4 sm:$0xff]  }
  0x5f   : > { %1854 = vmatmul.mubr.msk.bf16.gmra.mxu0 %vm415_vm0, %v2009_v5  ;;  %v2040_v5 = vld [vmem:[%s2373_s7] ss:$8 sps:$4 sm:$0xff]  }
  0x60   : > { %1857 = vmatprep.mubr.msk.bf16.mxu0 %vm415_vm0, %v2010_v6  ;;  %v2025_v6 = vld [vmem:[%s2373_s7 + $0x64] ss:$8 sps:$4 sm:$0xff]  }
  0x67   : > { %1858 = vmatmul.mubr.msk.bf16.gmra.mxu0 %vm415_vm0, %v2011_v7  ;;  %v2046_v7 = vld [vmem:[%s2373_s7 + $0x14] ss:$8 sps:$4 sm:$0xff]  }
  0x68   : > { %1861 = vmatprep.mubr.msk.bf16.mxu0 %vm415_vm0, %v2012_v8  ;;  %v2027_v8 = vld [vmem:[%s2373_s7 + $0x60] ss:$8 sps:$4 sm:$0xff]  }
  0x6f   : > { %1862 = vmatmul.mubr.msk.bf16.gmra.mxu0 %vm415_vm0, %v2013_v9  ;;  %v2048_v9 = vld [vmem:[%s2373_s7 + $0x10] ss:$8 sps:$4 sm:$0xff]  }
  0x70   : > { %1865 = vmatprep.mubr.msk.bf16.mxu0 %vm415_vm0, %v2014_v10  ;;  %v2028_v10 = vld [vmem:[%s2373_s7 + $0x74] ss:$8 sps:$4 sm:$0xff]  }
  0x77   : > { %1866 = vmatmul.mubr.msk.bf16.gmra.mxu0 %vm415_vm0, %v2015_v11  ;;  %v2052_v11 = vld [vmem:[%s2373_s7 + $0x24] ss:$8 sps:$4 sm:$0xff]  }
  0x78   : > { %1869 = vmatprep.mubr.msk.bf16.mxu0 %vm415_vm0, %v2016_v12  ;;  %v2030_v12 = vld [vmem:[%s2373_s7 + $0x70] ss:$8 sps:$4 sm:$0xff]  }
  0x7f   : > { %1870 = vmatmul.mubr.msk.bf16.gmra.mxu0 %vm415_vm0, %v2017_v13  ;;  %v2054_v13 = vld [vmem:[%s2373_s7 + $0x20] ss:$8 sps:$4 sm:$0xff]  }
  0x80   : > { %1873 = vmatprep.mubr.msk.bf16.mxu0 %vm415_vm0, %v2018_v14  ;;  %v2031_v14 = vld [vmem:[%s2373_s7 + $0x84] ss:$8 sps:$4 sm:$0xff]  }
  0x87   : > { %1874 = vmatmul.mubr.msk.bf16.gmra.mxu0 %vm415_vm0, %v2019_v15  ;;  %v2058_v15 = vld [vmem:[%s2373_s7 + $0x34] ss:$8 sps:$4 sm:$0xff]  }
  0x88   : > { %1877 = vmatprep.mubr.msk.bf16.mxu0 %vm415_vm0, %v2020_v16  ;;  %v2033_v16 = vld [vmem:[%s2373_s7 + $0x80] ss:$8 sps:$4 sm:$0xff]  }
  0x8f   : > { %1878 = vmatmul.mubr.msk.bf16.gmra.mxu0 %vm415_vm0, %v2021_v17  ;;  %v2060_v17 = vld [vmem:[%s2373_s7 + $0x30] ss:$8 sps:$4 sm:$0xff]  }
  0x90   : > { %897 = vmatprep.mubr.bf16.mxu0 %v2042_v24  ;;  %v2043_v24 = vld [vmem:[%s2373_s7 + $0xb4] ss:$8 sps:$4 sm:$0xff]  }
 0x117   : > { %v1851_v19 = vpop.f32.mrf.mxu0 }
 0x119   : > { %v498_v20 = vpop.f32.mrf.mxu0 }
 0x11b   : > { %v1852_v21 = vpop.f32.mrf.mxu0 }
 0x11c   : > { %v2427_v22 = vpack.c.bf16 %v1852_v21, %v1851_v19  ;;  %v2064_v19 = vld [vmem:[%s2373_s7 + $0x44] ss:$8 sps:$4 sm:$0xff]   ;;  %v2066_v21 = vld [vmem:[%s2373_s7 + $0x40] ss:$8 sps:$4 sm:$0xff]  }
 0x11d   : > { %v501_v23 = vpop.f32.mrf.mxu0 }
 0x11e   : > { %v2430_v25 = vpack.c.bf16 %v501_v23, %v498_v20  ;;  %v2036_v20 = vld [vmem:[%s2373_s7 + $0x90] ss:$8 sps:$4 sm:$0xff]   ;;  %v2039_v23 = vld [vmem:[%s2373_s7 + $0xa0] ss:$8 sps:$4 sm:$0xff]  }
 0x11f   : > { %v1855_v26 = vpop.f32.mrf.mxu0 }
 0x121   : > { %v514_v27 = vpop.f32.mrf.mxu0 }
 0x123   : > { %v1856_v28 = vpop.f32.mrf.mxu0 }
 0x124   : > { %v692_v29 = vpack.c.bf16 %v1856_v28, %v1855_v26  ;;  %v2049_v26 = vld [vmem:[%s2373_s7 + $0xc4] ss:$8 sps:$4 sm:$0xff]   ;;  %v2055_v28 = vld [vmem:[%s2373_s7 + $0xd4] ss:$8 sps:$4 sm:$0xff]  }
 0x125   : > { %v517_v30 = vpop.f32.mrf.mxu0 }
 0x126   : > { %v691_v31 = vpack.c.bf16 %v517_v30, %v514_v27  ;;  %v2051_v27 = vld [vmem:[%s2373_s7 + $0xc0] ss:$8 sps:$4 sm:$0xff]   ;;  %v2061_v30 = vld [vmem:[%s2373_s7 + $0xe4] ss:$8 sps:$4 sm:$0xff]  }
 0x127   : > { %v1859_v32 = vpop.f32.mrf.mxu0 }
 0x129   : > { %v530_v33 = vpop.f32.mrf.mxu0 }
 0x12b   : > { %v1860_v34 = vpop.f32.mrf.mxu0 }
 0x12c   : > { %v694_v61 = vpack.c.bf16 %v1860_v34, %v1859_v32  ;;  %v2067_v32 = vld [vmem:[%s2373_s7 + $0xf4] ss:$8 sps:$4 sm:$0xff]  }
 0x12d   : > { %v533_v35 = vpop.f32.mrf.mxu0 }
 0x12e   : > { %v693_v63 = vpack.c.bf16 %v533_v35, %v530_v33  ;;  %v2069_v33 = vld [vmem:[%s2373_s7 + $0xf0] ss:$8 sps:$4 sm:$0xff]  }
 0x12f   : > { %v1863_v36 = vpop.f32.mrf.mxu0 }
 0x131   : > { %v546_v37 = vpop.f32.mrf.mxu0 }
 0x133   : > { %v1864_v38 = vpop.f32.mrf.mxu0 }
 0x134   : > { %v696_v56 = vpack.c.bf16 %v1864_v38, %v1863_v36  ;;  %v635_v36 = vld [vmem:[#allocation2 + $0xe8] sm:$0xff]  ;;  %v625_v38 = vld [vmem:[#allocation2 + $0xb0] sm:$0xff] }
 0x135   : > { %v549_v39 = vpop.f32.mrf.mxu0 }
 0x136   : > { %v695_v59 = vpack.c.bf16 %v549_v39, %v546_v37 }
 0x137   : > { %v1867_v40 = vpop.f32.mrf.mxu0 }
 0x139   : > { %v562_v41 = vpop.f32.mrf.mxu0 }
 0x13b   : > { %v1868_v42 = vpop.f32.mrf.mxu0 }
 0x13c   : > { %v698_v2 = vpack.c.bf16 %v1868_v42, %v1867_v40 }
 0x13d   : > { %v565_v43 = vpop.f32.mrf.mxu0 }
 0x13e   : > { %v697_v3 = vpack.c.bf16 %v565_v43, %v562_v41 }
 0x13f   : > { %v1871_v44 = vpop.f32.mrf.mxu0 }
 0x141   : > { %v578_v45 = vpop.f32.mrf.mxu0 }
 0x143   : > { %v1872_v46 = vpop.f32.mrf.mxu0 }
 0x144   : > { %v700_v0 = vpack.c.bf16 %v1872_v46, %v1871_v44  ;;  %v636_v46 = vld [vmem:[#allocation2 + $0xb8] sm:$0xff] }
 0x145   : > { %v581_v47 = vpop.f32.mrf.mxu0 }
 0x146   : > { %v699_v1 = vpack.c.bf16 %v581_v47, %v578_v45 }
 0x147   : > { %v1875_v48 = vpop.f32.mrf.mxu0 }
 0x149   : > { %v594_v49 = vpop.f32.mrf.mxu0 }
 0x14b   : > { %v1876_v50 = vpop.f32.mrf.mxu0 }
 0x14c   : > { %v702_v60 = vpack.c.bf16 %v1876_v50, %v1875_v48  ;;  %v626_v48 = vld [vmem:[#allocation2] sm:$0xff] }
 0x14d   : > { %v597_v51 = vpop.f32.mrf.mxu0 }
 0x14e   : > { %v701_v62 = vpack.c.bf16 %v597_v51, %v594_v49 }
 0x14f   : > { %v1879_v52 = vpop.f32.mrf.mxu0 }
 0x151   : > { %v610_v53 = vpop.f32.mrf.mxu0 }
 0x153   : > { %v1880_v54 = vpop.f32.mrf.mxu0 }
 0x154   : > { %v704_v55 = vpack.c.bf16 %v1880_v54, %v1879_v52 }
 0x155   : > { %v613_v57 = vpop.f32.mrf.mxu0 }
 0x156   : > { %v703_v58 = vpack.c.bf16 %v613_v57, %v610_v53  ;;  %1735 = vmatprep.subr.bf16.mxu0 %v704_v55  ;;  %1881 = vmatprep.subr.bf16.mxu1 %v704_v55 }
 0x157   : > { %1736 = vmatpush3.bf16.msra.mxu0 %v696_v56  ;;  %1889 = vmatpush3.bf16.msra.mxu1 %v696_v56  ;;  %v637_v56 = vld [vmem:[#allocation2 + $0x60] sm:$0xff] }
 0x158   : > { %1737 = vmatprep.subr.bf16.mxu0 %v703_v58  ;;  %1882 = vmatprep.subr.bf16.mxu1 %v703_v58  ;;  %v627_v58 = vld [vmem:[#allocation2 + $0xd8] sm:$0xff] }
 0x15b   : > { %1738 = vmatpush3.bf16.msra.mxu0 %v695_v59  ;;  %1890 = vmatpush3.bf16.msra.mxu1 %v695_v59 }
 0x15c   : > { %1739 = vmatprep.subr.bf16.mxu0 %v702_v60  ;;  %1883 = vmatprep.subr.bf16.mxu1 %v702_v60 }
 0x15f   : > { %1740 = vmatpush3.bf16.msra.mxu0 %v694_v61  ;;  %1891 = vmatpush3.bf16.msra.mxu1 %v694_v61 }
 0x160   : > { %1741 = vmatprep.subr.bf16.mxu0 %v701_v62  ;;  %1884 = vmatprep.subr.bf16.mxu1 %v701_v62 }
 0x163   : > { %1742 = vmatpush3.bf16.msra.mxu0 %v693_v63  ;;  %1892 = vmatpush3.bf16.msra.mxu1 %v693_v63 }
 0x164   : > { %1743 = vmatprep.subr.bf16.mxu0 %v700_v0  ;;  %1885 = vmatprep.subr.bf16.mxu1 %v700_v0 }
 0x167   : > { %1744 = vmatpush3.bf16.msra.mxu0 %v692_v29  ;;  %1893 = vmatpush3.bf16.msra.mxu1 %v692_v29  ;;  %v2057_v29 = vld [vmem:[%s2373_s7 + $0xd0] ss:$8 sps:$4 sm:$0xff]  }
 0x168   : > { %1745 = vmatprep.subr.bf16.mxu0 %v699_v1  ;;  %1886 = vmatprep.subr.bf16.mxu1 %v699_v1 }
 0x16b   : > { %1746 = vmatpush3.bf16.msra.mxu0 %v691_v31  ;;  %1894 = vmatpush3.bf16.msra.mxu1 %v691_v31  ;;  %v2063_v31 = vld [vmem:[%s2373_s7 + $0xe0] ss:$8 sps:$4 sm:$0xff]  }
 0x16c   : > { %1747 = vmatprep.subr.bf16.mxu0 %v698_v2  ;;  %1887 = vmatprep.subr.bf16.mxu1 %v698_v2  ;;  %v638_v2 = vld [vmem:[#allocation2 + $0xf0] sm:$0xff] }
 0x16f   : > { %1748 = vmatpush3.bf16.msra.mxu0 %v2427_v22  ;;  %1895 = vmatpush3.bf16.msra.mxu1 %v2427_v22  ;;  %v2037_v22 = vld [vmem:[%s2373_s7 + $0xa4] ss:$8 sps:$4 sm:$0xff]  }
 0x170   : > { %1749 = vmatprep.subr.bf16.mxu0 %v697_v3  ;;  %1888 = vmatprep.subr.bf16.mxu1 %v697_v3 }
 0x173   : > { %1750 = vmatpush3.bf16.msra.mxu0 %v2430_v25  ;;  %1896 = vmatpush3.bf16.msra.mxu1 %v2430_v25  ;;  %v2045_v25 = vld [vmem:[%s2373_s7 + $0xb0] ss:$8 sps:$4 sm:$0xff]  }
 0x176   : > { %938 = vmatmul.mubr.bf16.vlgmr.msra.gmra.mxu1 %v2022_v4  ;;  %898 = vmatmul.mubr.bf16.vlgmr.msra.gmra.mxu0 %v2040_v5  ;;  %v628_v4 = vld [vmem:[#allocation2 + $0x18] sm:$0xff] }
 0x177   : > { %945 = vmatprep.mubr.bf16.mxu1 %v2025_v6  ;;  %905 = vmatprep.mubr.bf16.mxu0 %v2046_v7 }
 0x17e   : > { %946 = vmatmul.mubr.bf16.gmra.mxu1 %v2027_v8  ;;  %906 = vmatmul.mubr.bf16.gmra.mxu0 %v2048_v9 }
 0x17f   : > { %953 = vmatprep.mubr.bf16.mxu1 %v2028_v10  ;;  %913 = vmatprep.mubr.bf16.mxu0 %v2052_v11 }
 0x186   : > { %954 = vmatmul.mubr.bf16.gmra.mxu1 %v2030_v12  ;;  %914 = vmatmul.mubr.bf16.gmra.mxu0 %v2054_v13  ;;  %v639_v12 = vld [vmem:[#allocation2 + $0x8] sm:$0xff] }
 0x187   : > { %961 = vmatprep.mubr.bf16.mxu1 %v2031_v14  ;;  %921 = vmatprep.mubr.bf16.mxu0 %v2058_v15  ;;  %v629_v14 = vld [vmem:[#allocation2 + $0x50] sm:$0xff] }
 0x18e   : > { %962 = vmatmul.mubr.bf16.gmra.mxu1 %v2033_v16  ;;  %922 = vmatmul.mubr.bf16.gmra.mxu0 %v2060_v17 }
 0x18f   : > { %969 = vmatprep.mubr.bf16.mxu1 %v2034_v18  ;;  %929 = vmatprep.mubr.bf16.mxu0 %v2064_v19 }
 0x196   : > { %970 = vmatmul.mubr.bf16.gmra.mxu1 %v2036_v20  ;;  %930 = vmatmul.mubr.bf16.gmra.mxu0 %v2066_v21 }
 0x197   : > { %977 = vmatprep.mubr.bf16.mxu1 %v2037_v22  ;;  %v640_v22 = vld [vmem:[#allocation2 + $0x78] sm:$0xff] }
 0x19e   : > { %978 = vmatmul.mubr.bf16.gmra.mxu1 %v2039_v23 }
 0x19f   : > { %985 = vmatprep.mubr.bf16.mxu1 %v2043_v24  ;;  %v630_v24 = vld [vmem:[#allocation2 + $0x68] sm:$0xff] }
 0x1a6   : > { %986 = vmatmul.mubr.bf16.gmra.mxu1 %v2045_v25 }
 0x1a7   : > { %993 = vmatprep.mubr.bf16.mxu1 %v2049_v26 }
 0x1ae   : > { %994 = vmatmul.mubr.bf16.gmra.mxu1 %v2051_v27 }
 0x1af   : > { %1001 = vmatprep.mubr.bf16.mxu1 %v2055_v28 }
 0x1b6   : > { %1002 = vmatmul.mubr.bf16.gmra.mxu1 %v2057_v29 }
 0x1b7   : > { %1009 = vmatprep.mubr.bf16.mxu1 %v2061_v30 }
 0x1be   : > { %1010 = vmatmul.mubr.bf16.gmra.mxu1 %v2063_v31 }
 0x1bf   : > { %1017 = vmatprep.mubr.bf16.mxu1 %v2067_v32  ;;  %v641_v32 = vld [vmem:[#allocation2 + $0x38] sm:$0xff] }
 0x1c6   : > { %1018 = vmatmul.mubr.bf16.gmra.mxu1 %v2069_v33 }
 0x236   : > { %v1781_v34 = vpop.f32.mrf.mxu1  ;;  %v1751_v35 = vpop.f32.mrf.mxu0 }
 0x238   : > { %v1782_v37 = vpop.f32.mrf.mxu1  ;;  %v1752_v39 = vpop.f32.mrf.mxu0 }
 0x239   : > { %v1783_v40 = vadd.f32 %v1782_v37, %v1781_v34  ;;  %v1753_v41 = vadd.f32 %v1752_v39, %v1751_v35  ;;  %v631_v34 = vld [vmem:[#allocation2 + $0x30] sm:$0xff] }
 0x23a   : > { %v1784_v42 = vpop.f32.mrf.mxu1  ;;  %v1754_v43 = vpop.f32.mrf.mxu0 }
 0x23b   : > { %v1036_v44 = vadd.f32 %v1783_v40, %v635_v36  ;;  %v1026_v45 = vadd.f32 %v1753_v41, %v625_v38 }
 0x23c   : > { %v1785_v47 = vpop.f32.mrf.mxu1  ;;  %v1755_v49 = vpop.f32.mrf.mxu0 }
 0x23d   : > { %1068 = vst [vmem:[#allocation2 + $0xe8] sm:$0xff] %v1036_v44  ;;  %v1786_v50 = vadd.f32 %v1785_v47, %v1784_v42  ;;  %1058 = vst [vmem:[#allocation2 + $0xb0] sm:$0xff] %v1026_v45  ;;  %v1756_v51 = vadd.f32 %v1755_v49, %v1754_v43  ;;  %v642_v42 = vld [vmem:[#allocation2 + $0x58] sm:$0xff]  ;;  %v632_v44 = vld [vmem:[#allocation2 + $0x48] sm:$0xff] }
 0x23e   : > { %v1787_v52 = vpop.f32.mrf.mxu1  ;;  %v1757_v53 = vpop.f32.mrf.mxu0 }
 0x23f   : > { %v1037_v54 = vadd.f32 %v1786_v50, %v636_v46  ;;  %v1027_v55 = vadd.f32 %v1756_v51, %v626_v48 }
 0x240   : > { %v1788_v57 = vpop.f32.mrf.mxu1  ;;  %v1758_v59 = vpop.f32.mrf.mxu0 }
 0x241   : > { %1069 = vst [vmem:[#allocation2 + $0xb8] sm:$0xff] %v1037_v54  ;;  %v1789_v60 = vadd.f32 %v1788_v57, %v1787_v52  ;;  %1059 = vst [vmem:[#allocation2] sm:$0xff] %v1027_v55  ;;  %v1759_v61 = vadd.f32 %v1758_v59, %v1757_v53  ;;  %v643_v52 = vld [vmem:[#allocation2 + $0x40] sm:$0xff] }
 0x242   : > { %v1790_v62 = vpop.f32.mrf.mxu1  ;;  %v1760_v63 = vpop.f32.mrf.mxu0  ;;  %v633_v54 = vld [vmem:[#allocation2 + $0x80] sm:$0xff] }
 0x243   : > { %v1038_v0 = vadd.f32 %v1789_v60, %v637_v56  ;;  %v1028_v1 = vadd.f32 %v1759_v61, %v627_v58 }
 0x244   : > { %v1791_v3 = vpop.f32.mrf.mxu1  ;;  %v1761_v5 = vpop.f32.mrf.mxu0 }
 0x245   : > { %1070 = vst [vmem:[#allocation2 + $0x60] sm:$0xff] %v1038_v0  ;;  %v1792_v6 = vadd.f32 %v1791_v3, %v1790_v62  ;;  %1060 = vst [vmem:[#allocation2 + $0xd8] sm:$0xff] %v1028_v1  ;;  %v1762_v7 = vadd.f32 %v1761_v5, %v1760_v63  ;;  %v644_v62 = vld [vmem:[#allocation2 + $0xc8] sm:$0xff] }
 0x246   : > { %v1793_v8 = vpop.f32.mrf.mxu1  ;;  %v1763_v9 = vpop.f32.mrf.mxu0  ;;  %v634_v0 = vld [vmem:[#allocation2 + $0x88] sm:$0xff] }
 0x247   : > { %v1039_v10 = vadd.f32 %v1792_v6, %v638_v2  ;;  %v1029_v11 = vadd.f32 %v1762_v7, %v628_v4  ;;  %v645_v7 = vld [vmem:[#allocation2 + $0xe0] sm:$0xff] }
 0x248   : > { %v1794_v13 = vpop.f32.mrf.mxu1  ;;  %v1764_v15 = vpop.f32.mrf.mxu0 }
 0x249   : > { %1071 = vst [vmem:[#allocation2 + $0xf0] sm:$0xff] %v1039_v10  ;;  %v1795_v16 = vadd.f32 %v1794_v13, %v1793_v8  ;;  %1061 = vst [vmem:[#allocation2 + $0x18] sm:$0xff] %v1029_v11  ;;  %v1765_v17 = vadd.f32 %v1764_v15, %v1763_v9 }
 0x24a   : > { %v1796_v18 = vpop.f32.mrf.mxu1  ;;  %v1766_v19 = vpop.f32.mrf.mxu0 }
 0x24b   : > { %v1040_v20 = vadd.f32 %v1795_v16, %v639_v12  ;;  %v1030_v21 = vadd.f32 %v1765_v17, %v629_v14  ;;  %v646_v12 = vld [vmem:[#allocation2 + $0x90] sm:$0xff] }
 0x24c   : > { %v1797_v23 = vpop.f32.mrf.mxu1  ;;  %v1767_v25 = vpop.f32.mrf.mxu0  ;;  %v647_v17 = vld [vmem:[#allocation2 + $0x70] sm:$0xff] }
 0x24d   : > { %1072 = vst [vmem:[#allocation2 + $0x8] sm:$0xff] %v1040_v20  ;;  %v1798_v26 = vadd.f32 %v1797_v23, %v1796_v18  ;;  %1062 = vst [vmem:[#allocation2 + $0x50] sm:$0xff] %v1030_v21  ;;  %v1768_v27 = vadd.f32 %v1767_v25, %v1766_v19 }
 0x24e   : > { %v1799_v28 = vpop.f32.mrf.mxu1  ;;  %v1769_v29 = vpop.f32.mrf.mxu0 }
 0x24f   : > { %v1041_v30 = vadd.f32 %v1798_v26, %v640_v22  ;;  %v1031_v31 = vadd.f32 %v1768_v27, %v630_v24  ;;  %v648_v22 = vld [vmem:[#allocation2 + $0xc0] sm:$0xff]  ;;  %v649_v27 = vld [vmem:[#allocation2 + $0xa8] sm:$0xff] }
 0x250   : > { %v1800_v33 = vpop.f32.mrf.mxu1  ;;  %v1770_v35 = vpop.f32.mrf.mxu0 }
 0x251   : > { %1073 = vst [vmem:[#allocation2 + $0x78] sm:$0xff] %v1041_v30  ;;  %v1801_v36 = vadd.f32 %v1800_v33, %v1799_v28  ;;  %1063 = vst [vmem:[#allocation2 + $0x68] sm:$0xff] %v1031_v31  ;;  %v1771_v37 = vadd.f32 %v1770_v35, %v1769_v29 }
 0x252   : > { %v1802_v38 = vpop.f32.mrf.mxu1  ;;  %v1772_v39 = vpop.f32.mrf.mxu0 }
 0x253   : > { %v1042_v40 = vadd.f32 %v1801_v36, %v641_v32  ;;  %v1032_v41 = vadd.f32 %v1771_v37, %v631_v34  ;;  %v650_v32 = vld [vmem:[#allocation2 + $0xd0] sm:$0xff] }
 0x254   : > { %v1803_v43 = vpop.f32.mrf.mxu1  ;;  %v1773_v45 = vpop.f32.mrf.mxu0  ;;  %v651_v37 = vld [vmem:[#allocation2 + $0x10] sm:$0xff] }
 0x255   : > { %1074 = vst [vmem:[#allocation2 + $0x38] sm:$0xff] %v1042_v40  ;;  %v1804_v46 = vadd.f32 %v1803_v43, %v1802_v38  ;;  %1064 = vst [vmem:[#allocation2 + $0x30] sm:$0xff] %v1032_v41  ;;  %v1774_v47 = vadd.f32 %v1773_v45, %v1772_v39 }
 0x256   : > { %v1805_v48 = vpop.f32.mrf.mxu1  ;;  %v1775_v49 = vpop.f32.mrf.mxu0 }
 0x257   : > { %v1043_v50 = vadd.f32 %v1804_v46, %v642_v42  ;;  %v1033_v51 = vadd.f32 %v1774_v47, %v632_v44  ;;  %v652_v42 = vld [vmem:[#allocation2 + $0x28] sm:$0xff]  ;;  %v653_v47 = vld [vmem:[#allocation2 + $0xa0] sm:$0xff] }
 0x258   : > { %v1806_v53 = vpop.f32.mrf.mxu1  ;;  %v1776_v55 = vpop.f32.mrf.mxu0 }
 0x259   : > { %1075 = vst [vmem:[#allocation2 + $0x58] sm:$0xff] %v1043_v50  ;;  %v1807_v56 = vadd.f32 %v1806_v53, %v1805_v48  ;;  %1065 = vst [vmem:[#allocation2 + $0x48] sm:$0xff] %v1033_v51  ;;  %v1777_v57 = vadd.f32 %v1776_v55, %v1775_v49 }
 0x25a   : > { %v1808_v58 = vpop.f32.mrf.mxu1  ;;  %v1778_v59 = vpop.f32.mrf.mxu0 }
 0x25b   : > { %v1044_v60 = vadd.f32 %v1807_v56, %v643_v52  ;;  %v1034_v61 = vadd.f32 %v1777_v57, %v633_v54  ;;  %v654_v52 = vld [vmem:[#allocation2 + $0xf8] sm:$0xff]  ;;  %v655_v57 = vld [vmem:[#allocation2 + $0x20] sm:$0xff] }
 0x25c   : > { %v1809_v63 = vpop.f32.mrf.mxu1  ;;  %v1779_v1 = vpop.f32.mrf.mxu0 }
 0x25d   : > { %1076 = vst [vmem:[#allocation2 + $0x40] sm:$0xff] %v1044_v60  ;;  %v1810_v2 = vadd.f32 %v1809_v63, %v1808_v58  ;;  %1066 = vst [vmem:[#allocation2 + $0x80] sm:$0xff] %v1034_v61  ;;  %v1780_v3 = vadd.f32 %v1779_v1, %v1778_v59 }
 0x25e   : > { %v1811_v4 = vpop.f32.mrf.mxu1 }
 0x25f   : > { %v1045_v5 = vadd.f32 %v1810_v2, %v644_v62  ;;  %v1035_v6 = vadd.f32 %v1780_v3, %v634_v0  ;;  %v656_v62 = vld [vmem:[#allocation2 + $0x98] sm:$0xff] }
 0x260   : > { %v1812_v8 = vpop.f32.mrf.mxu1 }
 0x261   : > { %1077 = vst [vmem:[#allocation2 + $0xc8] sm:$0xff] %v1045_v5  ;;  %v1813_v9 = vadd.f32 %v1812_v8, %v1811_v4  ;;  %1067 = vst [vmem:[#allocation2 + $0x88] sm:$0xff] %v1035_v6 }
 0x262   : > { %v1814_v10 = vpop.f32.mrf.mxu1 }
 0x263   : > { %v1046_v11 = vadd.f32 %v1813_v9, %v645_v7 }
 0x264   : > { %v1815_v13 = vpop.f32.mrf.mxu1 }
 0x265   : > { %1078 = vst [vmem:[#allocation2 + $0xe0] sm:$0xff] %v1046_v11  ;;  %v1816_v14 = vadd.f32 %v1815_v13, %v1814_v10 }
 0x266   : > { %v1817_v15 = vpop.f32.mrf.mxu1 }
 0x267   : > { %v1047_v16 = vadd.f32 %v1816_v14, %v646_v12 }
 0x268   : > { %v1818_v18 = vpop.f32.mrf.mxu1 }
 0x269   : > { %1079 = vst [vmem:[#allocation2 + $0x90] sm:$0xff] %v1047_v16  ;;  %v1819_v19 = vadd.f32 %v1818_v18, %v1817_v15 }
 0x26a   : > { %v1820_v20 = vpop.f32.mrf.mxu1 }
 0x26b   : > { %v1048_v21 = vadd.f32 %v1819_v19, %v647_v17 }
 0x26c   : > { %v1821_v23 = vpop.f32.mrf.mxu1 }
 0x26d   : > { %1080 = vst [vmem:[#allocation2 + $0x70] sm:$0xff] %v1048_v21  ;;  %v1822_v24 = vadd.f32 %v1821_v23, %v1820_v20 }
 0x26e   : > { %v1823_v25 = vpop.f32.mrf.mxu1 }
 0x26f   : > { %v1049_v26 = vadd.f32 %v1822_v24, %v648_v22 }
 0x270   : > { %v1824_v28 = vpop.f32.mrf.mxu1 }
 0x271   : > { %1081 = vst [vmem:[#allocation2 + $0xc0] sm:$0xff] %v1049_v26  ;;  %v1825_v29 = vadd.f32 %v1824_v28, %v1823_v25 }
 0x272   : > { %v1826_v30 = vpop.f32.mrf.mxu1 }
 0x273   : > { %v1050_v31 = vadd.f32 %v1825_v29, %v649_v27 }
 0x274   : > { %v1827_v33 = vpop.f32.mrf.mxu1 }
 0x275   : > { %1082 = vst [vmem:[#allocation2 + $0xa8] sm:$0xff] %v1050_v31  ;;  %v1828_v34 = vadd.f32 %v1827_v33, %v1826_v30 }
 0x276   : > { %v1829_v35 = vpop.f32.mrf.mxu1 }
 0x277   : > { %v1051_v36 = vadd.f32 %v1828_v34, %v650_v32 }
 0x278   : > { %v1830_v38 = vpop.f32.mrf.mxu1 }
 0x279   : > { %1083 = vst [vmem:[#allocation2 + $0xd0] sm:$0xff] %v1051_v36  ;;  %v1831_v39 = vadd.f32 %v1830_v38, %v1829_v35 }
 0x27a   : > { %v1832_v40 = vpop.f32.mrf.mxu1 }
 0x27b   : > { %v1052_v41 = vadd.f32 %v1831_v39, %v651_v37 }
 0x27c   : > { %v1833_v43 = vpop.f32.mrf.mxu1 }
 0x27d   : > { %1084 = vst [vmem:[#allocation2 + $0x10] sm:$0xff] %v1052_v41  ;;  %v1834_v44 = vadd.f32 %v1833_v43, %v1832_v40 }
 0x27e   : > { %v1835_v45 = vpop.f32.mrf.mxu1 }
 0x27f   : > { %v1053_v46 = vadd.f32 %v1834_v44, %v652_v42 }
 0x280   : > { %v1836_v48 = vpop.f32.mrf.mxu1 }
 0x281   : > { %1085 = vst [vmem:[#allocation2 + $0x28] sm:$0xff] %v1053_v46  ;;  %v1837_v49 = vadd.f32 %v1836_v48, %v1835_v45 }
 0x282   : > { %v1838_v50 = vpop.f32.mrf.mxu1 }
 0x283   : > { %v1054_v51 = vadd.f32 %v1837_v49, %v653_v47 }
 0x284   : > { %v1839_v53 = vpop.f32.mrf.mxu1 }
 0x285   : > { %1086 = vst [vmem:[#allocation2 + $0xa0] sm:$0xff] %v1054_v51  ;;  %v1840_v54 = vadd.f32 %v1839_v53, %v1838_v50 }
 0x286   : > { %v1841_v55 = vpop.f32.mrf.mxu1 }
 0x287   : > { %v1055_v56 = vadd.f32 %v1840_v54, %v654_v52 }
 0x288   : > { %v1842_v58 = vpop.f32.mrf.mxu1 }
 0x289   : > { %1087 = vst [vmem:[#allocation2 + $0xf8] sm:$0xff] %v1055_v56  ;;  %v1843_v59 = vadd.f32 %v1842_v58, %v1841_v55 }
 0x28a   : > { %v1844_v60 = vpop.f32.mrf.mxu1 }
 0x28b   : > { %v1056_v61 = vadd.f32 %v1843_v59, %v655_v57 }
 0x28c   : > { %v1845_v63 = vpop.f32.mrf.mxu1 }
 0x28d   : > { %1088 = vst [vmem:[#allocation2 + $0x20] sm:$0xff] %v1056_v61  ;;  %v1846_v0 = vadd.f32 %v1845_v63, %v1844_v60  ;;  %1093 = sbr.rel (%p1550_p7) target bundleno = 684 (0x2ac), region = 48 }
 0x28f   : > { %v1057_v1 = vadd.f32 %v1846_v0, %v656_v62 }
 0x291   : > { %1089 = vst [vmem:[#allocation2 + $0x98] sm:$0xff] %v1057_v1 }
 0x292   : > { %v1094_v2 = vld [vmem:[#allocation2 + $0xb0] sm:$0xff]  ;;  %v1095_v3 = vld [vmem:[#allocation2] sm:$0xff]  ;;  %v1096_v7 = vld [vmem:[#allocation2 + $0xd8] sm:$0xff] }
 0x293   : > { %v2470_v4 = vld [vmem:[%s2594_s3] ss:$0 sm:$0xff]  ;;  %v1097_v8 = vld [vmem:[#allocation2 + $0x18] sm:$0xff]  ;;  %v1098_v9 = vld [vmem:[#allocation2 + $0x50] sm:$0xff] }
 0x294   : > { %v1133_v5 = vadd.f32 %v2470_v4, %v1094_v2  ;;  %v1134_v6 = vadd.f32 %v2470_v4, %v1095_v3  ;;  %v1135_v10 = vadd.f32 %v2470_v4, %v1096_v7  ;;  %v1136_v11 = vadd.f32 %v2470_v4, %v1097_v8  ;;  %v1099_v12 = vld [vmem:[#allocation2 + $0x68] sm:$0xff]  ;;  %v1100_v14 = vld [vmem:[#allocation2 + $0x30] sm:$0xff]  ;;  %v1102_v20 = vld [vmem:[#allocation2 + $0x80] sm:$0xff] }
 0x295   : > { %v1137_v13 = vadd.f32 %v2470_v4, %v1098_v9  ;;  %v1101_v15 = vld [vmem:[#allocation2 + $0x48] sm:$0xff]  ;;  %v1138_v18 = vadd.f32 %v2470_v4, %v1099_v12  ;;  %v1139_v19 = vadd.f32 %v2470_v4, %v1100_v14  ;;  %v1105_v27 = vld [vmem:[#allocation2 + $0xb8] sm:$0xff]  ;;  %v1106_v28 = vld [vmem:[#allocation2 + $0x60] sm:$0xff]  ;;  %v1141_v32 = vadd.f32 %v2470_v4, %v1102_v20 }
 0x296   : > { %v1165_v16 = vmax.f32 %v1133_v5, 0.0  ;;  %v1166_v17 = vmax.f32 %v1134_v6, 0.0  ;;  %v1103_v21 = vld [vmem:[#allocation2 + $0x88] sm:$0xff]  ;;  %v1167_v23 = vmax.f32 %v1135_v10, 0.0  ;;  %v1168_v24 = vmax.f32 %v1136_v11, 0.0  ;;  %v1107_v33 = vld [vmem:[#allocation2 + $0xf0] sm:$0xff] }
 0x297   : > { %v1104_v22 = vld [vmem:[#allocation2 + $0xe8] sm:$0xff]  ;;  %v1169_v25 = vmax.f32 %v1137_v13, 0.0  ;;  %v1140_v26 = vadd.f32 %v2470_v4, %v1101_v15  ;;  %v1170_v30 = vmax.f32 %v1138_v18, 0.0  ;;  %v1171_v31 = vmax.f32 %v1139_v19, 0.0  ;;  %v1109_v39 = vld [vmem:[#allocation2 + $0x78] sm:$0xff]  ;;  %v1112_v50 = vld [vmem:[#allocation2 + $0x40] sm:$0xff] }
 0x298   : > { %v1626_v29 = vpack.c.bf16 %v1166_v17, %v1165_v16  ;;  %v1631_v34 = vpack.c.bf16 %v1168_v24, %v1167_v23  ;;  %v1142_v36 = vadd.f32 %v2470_v4, %v1103_v21  ;;  %v1143_v37 = vadd.f32 %v2470_v4, %v1104_v22  ;;  %v1108_v38 = vld [vmem:[#allocation2 + $0x8] sm:$0xff]  ;;  %v1110_v44 = vld [vmem:[#allocation2 + $0x38] sm:$0xff]  ;;  %v1114_v60 = vld [vmem:[#allocation2 + $0xe0] sm:$0xff] }
 0x299   : > { %v1172_v35 = vmax.f32 %v1140_v26, 0.0  ;;  %v1636_v40 = vpack.c.bf16 %v1170_v30, %v1169_v25  ;;  %v1173_v41 = vmax.f32 %v1141_v32, 0.0  ;;  %v1144_v42 = vadd.f32 %v2470_v4, %v1105_v27  ;;  %v1111_v45 = vld [vmem:[#allocation2 + $0x58] sm:$0xff]  ;;  %v1113_v55 = vld [vmem:[#allocation2 + $0xc8] sm:$0xff]  ;;  %v1115_v61 = vld [vmem:[#allocation2 + $0x90] sm:$0xff] }
 0x29a   : > { %1627 = vst [vmem:[%s2388_s6] sm:$0xff] %v1626_v29   ;;  %v1145_v43 = vadd.f32 %v2470_v4, %v1106_v28  ;;  %1703 = vst [vmem:[%s2388_s6 + $0x8] sm:$0xff] %v1631_v34   ;;  %v1174_v47 = vmax.f32 %v1142_v36, 0.0  ;;  %v1175_v48 = vmax.f32 %v1143_v37, 0.0  ;;  %v1146_v49 = vadd.f32 %v2470_v4, %v1107_v33  ;;  %v1116_v2 = vld [vmem:[#allocation2 + $0x70] sm:$0xff]  ;;  %v1117_v3 = vld [vmem:[#allocation2 + $0xc0] sm:$0xff] }
 0x29b   : > { %v1641_v46 = vpack.c.bf16 %v1172_v35, %v1171_v31  ;;  %1704 = vst [vmem:[%s2388_s6 + $0x10] sm:$0xff] %v1636_v40   ;;  %v1176_v51 = vmax.f32 %v1144_v42, 0.0  ;;  %v1147_v53 = vadd.f32 %v2470_v4, %v1108_v38  ;;  %v1148_v54 = vadd.f32 %v2470_v4, %v1109_v39  ;;  %v1118_v9 = vld [vmem:[#allocation2 + $0xa8] sm:$0xff]  ;;  %v1119_v10 = vld [vmem:[#allocation2 + $0xd0] sm:$0xff]  ;;  %v1122_v25 = vld [vmem:[#allocation2 + $0xa0] sm:$0xff] }
 0x29c   : > { %v1177_v52 = vmax.f32 %v1145_v43, 0.0  ;;  %v1646_v56 = vpack.c.bf16 %v1174_v47, %v1173_v41  ;;  %v1178_v57 = vmax.f32 %v1146_v49, 0.0  ;;  %v1149_v58 = vadd.f32 %v2470_v4, %v1110_v44  ;;  %v1120_v15 = vld [vmem:[#allocation2 + $0x10] sm:$0xff]  ;;  %v1121_v20 = vld [vmem:[#allocation2 + $0x28] sm:$0xff]  ;;  %v1123_v26 = vld [vmem:[#allocation2 + $0xf8] sm:$0xff] }
 0x29d   : > { %1705 = vst [vmem:[%s2388_s6 + $0x18] sm:$0xff] %v1641_v46   ;;  %v1150_v59 = vadd.f32 %v2470_v4, %v1111_v45  ;;  %v1651_v62 = vpack.c.bf16 %v1176_v51, %v1175_v48  ;;  %v1179_v63 = vmax.f32 %v1147_v53, 0.0  ;;  %v1180_v0 = vmax.f32 %v1148_v54, 0.0  ;;  %v1124_v31 = vld [vmem:[#allocation2 + $0x20] sm:$0xff]  ;;  %v1125_v32 = vld [vmem:[#allocation2 + $0x98] sm:$0xff] }
 0x29e   : > { %v1151_v1 = vadd.f32 %v2470_v4, %v1112_v50  ;;  %1706 = vst [vmem:[%s2388_s6 + $0x20] sm:$0xff] %v1646_v56   ;;  %v1656_v5 = vpack.c.bf16 %v1178_v57, %v1177_v52  ;;  %v1181_v6 = vmax.f32 %v1149_v58, 0.0  ;;  %v1152_v8 = vadd.f32 %v2470_v4, %v1113_v55 }
 0x29f   : > { %v1182_v7 = vmax.f32 %v1150_v59, 0.0  ;;  %1707 = vst [vmem:[%s2388_s6 + $0x28] sm:$0xff] %v1651_v62   ;;  %v1661_v11 = vpack.c.bf16 %v1180_v0, %v1179_v63  ;;  %v1153_v13 = vadd.f32 %v2470_v4, %v1114_v60  ;;  %v1154_v14 = vadd.f32 %v2470_v4, %v1115_v61 }
 0x2a0   : > { %v1183_v12 = vmax.f32 %v1151_v1, 0.0  ;;  %1708 = vst [vmem:[%s2388_s6 + $0x30] sm:$0xff] %v1656_v5   ;;  %v1184_v17 = vmax.f32 %v1152_v8, 0.0  ;;  %v1155_v18 = vadd.f32 %v2470_v4, %v1116_v2  ;;  %v1156_v19 = vadd.f32 %v2470_v4, %v1117_v3 }
 0x2a1   : > { %v1666_v16 = vpack.c.bf16 %v1182_v7, %v1181_v6  ;;  %1709 = vst [vmem:[%s2388_s6 + $0x38] sm:$0xff] %v1661_v11   ;;  %v1185_v21 = vmax.f32 %v1153_v13, 0.0  ;;  %v1186_v22 = vmax.f32 %v1154_v14, 0.0  ;;  %v1157_v23 = vadd.f32 %v2470_v4, %v1118_v9 }
 0x2a2   : > { %v1158_v24 = vadd.f32 %v2470_v4, %v1119_v10  ;;  %v1671_v27 = vpack.c.bf16 %v1184_v17, %v1183_v12  ;;  %v1187_v28 = vmax.f32 %v1155_v18, 0.0  ;;  %v1188_v29 = vmax.f32 %v1156_v19, 0.0 }
 0x2a3   : > { %1710 = vst [vmem:[%s2388_s6 + $0x40] sm:$0xff] %v1666_v16   ;;  %v1159_v30 = vadd.f32 %v2470_v4, %v1120_v15  ;;  %v1676_v33 = vpack.c.bf16 %v1186_v22, %v1185_v21  ;;  %v1189_v34 = vmax.f32 %v1157_v23, 0.0  ;;  %v1160_v36 = vadd.f32 %v2470_v4, %v1121_v20 }
 0x2a4   : > { %v1190_v35 = vmax.f32 %v1158_v24, 0.0  ;;  %1711 = vst [vmem:[%s2388_s6 + $0x48] sm:$0xff] %v1671_v27   ;;  %v1681_v37 = vpack.c.bf16 %v1188_v29, %v1187_v28  ;;  %v1161_v39 = vadd.f32 %v2470_v4, %v1122_v25  ;;  %v1162_v40 = vadd.f32 %v2470_v4, %v1123_v26 }
 0x2a5   : > { %v1191_v38 = vmax.f32 %v1159_v30, 0.0  ;;  %1712 = vst [vmem:[%s2388_s6 + $0x50] sm:$0xff] %v1676_v33   ;;  %v1192_v42 = vmax.f32 %v1160_v36, 0.0  ;;  %v1163_v43 = vadd.f32 %v2470_v4, %v1124_v31  ;;  %v1164_v44 = vadd.f32 %v2470_v4, %v1125_v32 }
 0x2a6   : > { %v1686_v41 = vpack.c.bf16 %v1190_v35, %v1189_v34  ;;  %1713 = vst [vmem:[%s2388_s6 + $0x58] sm:$0xff] %v1681_v37   ;;  %v1193_v45 = vmax.f32 %v1161_v39, 0.0  ;;  %v1194_v46 = vmax.f32 %v1162_v40, 0.0 }
 0x2a7   : > { %v1691_v47 = vpack.c.bf16 %v1192_v42, %v1191_v38  ;;  %v1195_v48 = vmax.f32 %v1163_v43, 0.0  ;;  %v1196_v49 = vmax.f32 %v1164_v44, 0.0 }
 0x2a8   : > { %1714 = vst [vmem:[%s2388_s6 + $0x60] sm:$0xff] %v1686_v41   ;;  %v1696_v50 = vpack.c.bf16 %v1194_v46, %v1193_v45 }
 0x2a9   : > { %1715 = vst [vmem:[%s2388_s6 + $0x68] sm:$0xff] %v1691_v47   ;;  %v1701_v51 = vpack.c.bf16 %v1196_v49, %v1195_v48 }
 0x2aa   : > { %1716 = vst [vmem:[%s2388_s6 + $0x70] sm:$0xff] %v1696_v50  }
 0x2ab   : > { %1717 = vst [vmem:[%s2388_s6 + $0x78] sm:$0xff] %v1701_v51  }
 0x2ac PF: > { %s1622_s21 = sshll.u32 %s2206_s22, 11  ;;  %s1371_s7 = sshll.u32 %s2388_s6, 4  ;;  %s2527_s7 = int_to_ptr.vmem [resolvable:$true] %s1371_s7 }
 0x2ad   : > { %s2524_s24 = scalar_lea.hbm %s2595_s4, %s1622_s21  ;;  %s2531_s29 = scalar_lea.sflag [#allocation5], %s246_s20 }
 0x2ae   : > { %s2098_s12 = scalar_lea.vmem %s2527_s7, 2048  ;;  %s2225_s22 = smov [#allocation6]  }
 0x2af   : > { %p2099_p8 = scmp.ne.s32.totalorder %s2527_s7, %s2098_s12  ;;  %s2102_s30 = sshll.u32 %s2225_s22, 4  ;;  %s2103_s30 = int_to_ptr.vmem [resolvable:$false] %s2102_s30 }
 0x2b0   : > { %s2104_s27 = scalar_lea.vmem %s2103_s30, 4096  ;;  %p2105_p3 = scmp.lt.s32.totalorder %s2527_s7, %s2103_s30 }
 0x2b1   : > { %p2100_p9 = pnand %p2099_p8, %p2335_p12  ;;  %p2106_p11 = scmp.lt.s32.totalorder %s2104_s27, %s2098_s12 }
 0x2b3   : > { %p2101_p10 = pneg %p2100_p9  ;;  %p2107_p13 = por %p2106_p11, %p2105_p3 }
 0x2b5   : > { %p2108_p0 = pnand %p2107_p13, %p2101_p10 }
 0x2b7   : > { %2111 = shalt.err (!%p2108_p0)
}
 0x2b8   : > { %s2112_s20 = scalar_lea.hbm %s2524_s24, 2048  ;;  %s2116_s6 = scalar_lea.hbm %s2595_s4, 4096 }
 0x2b9   : > { %p2113_p1 = scmp.ne.s32.totalorder %s2524_s24, %s2112_s20  ;;  %p2117_p5 = scmp.lt.s32.totalorder %s2524_s24, %s2595_s4 }
 0x2ba   : > { %p2118_p7 = scmp.lt.s32.totalorder %s2116_s6, %s2112_s20 }
 0x2bb   : > { %p2114_p6 = pnand %p2113_p1, %p2335_p12 }
 0x2bc   : > { %p2119_p8 = por %p2118_p7, %p2117_p5 }
 0x2bd   : > { %p2115_p4 = pneg %p2114_p6 }
 0x2bf   : > { %p2120_p9 = pnand %p2119_p8, %p2115_p4 }
 0x2c1   : > { %2123 = shalt.err (!%p2120_p9)
}
 0x2c2   : > { %s2226_s18 = smov 64   ;;  %s2227_s5 = smov 4  }
 0x2c3   : > { %1899 = dma.vmem_to_hbm [thread:$0]  (%p2335_p12), %s2527_s7, 2048, %s2524_s24, %s2531_s29, %s2226_s18, %s2226_s18, %s2227_s5  }
 0x2c4 PF: > { %p1910_p10 = scmp.ge.s32.totalorder %s2218_s25, 2  ;;  %s1386_s21 = sand.u32 1, %s2178_s15  }
 0x2c5   : > { %s1387_s9 = scalar_lea.sflag [#allocation5], %s1386_s21 }
 0x2c6   : > { %p1906_p3 = pnand %p1910_p10, %p2348_p2 }
 0x2c8   : > { %p1907_p11 = pneg %p1906_p3 }
 0x2ca   : > { %2173 = dma.done.wait (%p1907_p11), %s1387_s9, 2048  }
 0x2cb   : > { %2175 = vsyncadd (%p1907_p11), %s1387_s9, 4294965248  ;;  %s20_s25 = sadd.s32 1, %s2218_s25   ;;  %s2611_s10 = sld [smem:[#allocation13_spill]] }
 0x2cc   : > { %p17_p13 = scmp.ge.s32.totalorder %s20_s25, 6   ;;  %s2612_s11 = sld [smem:[#allocation9_spill]] }
 0x2cd   : > { %s2613_s20 = sld [smem:[#allocation14_spill]]  ;;  %s2617_s15 = smov %s2182_s16 }
 0x2ce   : > { %s2614_s22 = sld [smem:[#allocation10_spill]]  ;;  %s2618_s16 = smov %s2186_s17 }
 0x2cf   : > { %s2615_s24 = sld [smem:[#allocation11_spill]]  ;;  %s2620_s18 = smov %s2194_s19 }
 0x2d0   : > { %s2616_s7 = sld [smem:[#allocation12_spill]]  ;;  %s2622_s21 = smov %s2210_s23 }
 0x2d1   : > { %s2619_s17 = smov %s2611_s10 }
 0x2d2   : > { %s2621_s19 = smov %s2612_s11  ;;  %19 = sbr.rel (!%p17_p13) target bundleno = 9 (0x9), region = 92 }
 0x2d5   : > { %s2623_s23 = smov %s2615_s24 }
 0x2d6   : > { %s2624_s24 = smov %s2616_s7 }
 0x2d7   :  { %1392 = vsyncpa [#allocation4], 1 }
 0x2d8   :  { %1394 = vsyncpa [#allocation4 + $0x1], 1 }
 0x2d9   :  { %1395 = vsyncpa [#allocation5], 1 }
 0x2da   :  { %1397 = vsyncpa [#allocation5 + $0x1], 1 }

</bundles_post_ra>
